<compile_context>
chip_gen: v7x
topology: tpu7x:2x2x1
jax: 0.10.0
libtpu: 0.0.40
codegen_flags: <defaults>
</compile_context>

<pallas_src>
import functools

import jax
import jax.numpy as jnp
from jax.experimental import pallas as pl
from jax.experimental.pallas import tpu as pltpu


def _round_up(x, m):
    return ((x + m - 1) // m) * m


# -----------------------------------------------------------------------------
# Kernel 1: hoisted input projection  gi = x @ Wih_T + b  (both directions).
# Two separate dots written directly to VMEM output tiles (review item #1).
# -----------------------------------------------------------------------------
def _input_proj_kernel(x_ref, wf_ref, bf_ref, wb_ref, bb_ref, gif_ref, gib_ref):
    x = x_ref[...]
    gif_ref[...] = (
        jnp.dot(x, wf_ref[...], preferred_element_type=jnp.float32) + bf_ref[...])
    gib_ref[...] = (
        jnp.dot(x, wb_ref[...], preferred_element_type=jnp.float32) + bb_ref[...])


# -----------------------------------------------------------------------------
# Kernel 2: bidirectional GRU recurrence; one (batch-tile, timestep) grid step.
# -----------------------------------------------------------------------------
def _bigru_step_kernel(gif_ref, gib_ref, whh_f_ref, whh_b_ref,
                       bhhn_f_ref, bhhn_b_ref,
                       out_f_ref, out_b_ref, hid_ref,
                       h_f_sc, h_b_sc):
    t = pl.program_id(1)
    Hp = hid_ref.shape[-1]

    @pl.when(t == 0)
    def _():
        h_f_sc[...] = jnp.zeros_like(h_f_sc)
        h_b_sc[...] = jnp.zeros_like(h_b_sc)

    whh_f = whh_f_ref[...]
    whh_b = whh_b_ref[...]
    h_f = h_f_sc[...]
    h_b = h_b_sc[...]

    # Only the unavoidable h @ Whh matmuls remain on the serial critical path.
    gh_f = jnp.dot(h_f.astype(whh_f.dtype), whh_f, preferred_element_type=jnp.float32)
    gh_b = jnp.dot(h_b.astype(whh_b.dtype), whh_b, preferred_element_type=jnp.float32)

    def gru_update(gi, gh, h, bhh_n):
        # PyTorch gate order (r, z, n).  b_ir/b_iz/b_in and the folded b_hr/b_hz
        # are already inside gi; only b_hn is added here (inside r * (...)).
        r = jax.nn.sigmoid(gi[:, 0:Hp] + gh[:, 0:Hp])
        z = jax.nn.sigmoid(gi[:, Hp:2 * Hp] + gh[:, Hp:2 * Hp])
        n = jnp.tanh(gi[:, 2 * Hp:3 * Hp] + r * (gh[:, 2 * Hp:3 * Hp] + bhh_n))
        return (1.0 - z) * n + z * h

    h_f = gru_update(gif_ref[...], gh_f, h_f, bhhn_f_ref[...])
    h_b = gru_update(gib_ref[...], gh_b, h_b, bhhn_b_ref[...])

    h_f_sc[...] = h_f
    h_b_sc[...] = h_b
    out_f_ref[0] = h_f           # full (Bt, 128k)-dense stores, no masked vst
    out_b_ref[0] = h_b

    @pl.when(t == pl.num_programs(1) - 1)
    def _():
        hid_ref[0] = h_f
        hid_ref[1] = h_b


# -----------------------------------------------------------------------------
# Wrapper
# -----------------------------------------------------------------------------
@functools.partial(jax.jit, static_argnames=("mod", "use_bf16_matmul"))
def encoder_forward(tokens, params, mod, use_bf16_matmul=False):
    """tokens: [B, T] int32.  Returns (hidden_feature, outputs[B, T, 2H])."""
    B, T = tokens.shape
    E = params["emb"].shape[1]
    H = params["whh_f"].shape[1]          # whh is [3H, H]
    Hp = _round_up(H, 128)                 # lane-dense hidden size
    Bp = _round_up(B, 8)                   # sublane-dense batch
    if Bp > 128:
        Bp = _round_up(Bp, 128)
        Bt = 128
    else:
        Bt = Bp
    nb = Bp // Bt
    mxu_dtype = jnp.bfloat16 if use_bf16_matmul else jnp.float32

    # ---- glue: embedding gather (cheap XLA gather), time-major, batch pad ---
    x = params["emb"][tokens.T].astype(jnp.float32)          # [T, B, E]
    x = jnp.pad(x, ((0, 0), (0, Bp - B), (0, 0)))             # [T, Bp, E]
    rows = T * Bp
    tm = min(rows, 512)                                       # row tile (mult of 8)
    rows_pad = _round_up(rows, tm)
    x = x.reshape(rows, E)
    if rows_pad != rows:
        x = jnp.pad(x, ((0, rows_pad - rows), (0, 0)))
    x = x.astype(mxu_dtype)

    # ---- pack / pad weights once (gate boundaries kept Hp-aligned) ----------
    def pad_wih(w):        # [3H, E] -> [E, 3*Hp]
        w = w.T.reshape(E, 3, H)
        return jnp.pad(w, ((0, 0), (0, 0), (0, Hp - H))).reshape(E, 3 * Hp)

    def pad_whh(w):        # [3H, H] -> [Hp, 3*Hp]
        w = w.T.reshape(H, 3, H)
        return jnp.pad(w, ((0, Hp - H), (0, 0), (0, Hp - H))).reshape(Hp, 3 * Hp)

    def fold_bias(bih, bhh):   # fold b_hr/b_hz into the input bias (once)
        folded = jnp.concatenate([bih[:2 * H] + bhh[:2 * H], bih[2 * H:]])
        return jnp.pad(folded.reshape(3, H), ((0, 0), (0, Hp - H))).reshape(1, 3 * Hp)

    wih_f = pad_wih(params["wih_f"]).astype(mxu_dtype)
    wih_b = pad_wih(params["wih_b"]).astype(mxu_dtype)
    whh_f = pad_whh(params["whh_f"]).astype(mxu_dtype)
    whh_b = pad_whh(params["whh_b"]).astype(mxu_dtype)
    bih_f = fold_bias(params["bih_f"], params["bhh_f"])
    bih_b = fold_bias(params["bih_b"], params["bhh_b"])
    bhhn_f = jnp.pad(params["bhh_f"][2 * H:].reshape(1, H), ((0, 0), (0, Hp - H)))
    bhhn_b = jnp.pad(params["bhh_b"][2 * H:].reshape(1, H), ((0, 0), (0, Hp - H)))

    def _vmem_limit(block_elems, scratch_elems=0):
        # double-buffered blocks + scratch + headroom; re-derive per generation
        # (v5e/v6e 128 MiB physical, v7x 64 MiB) when scaling up.
        need = (2 * block_elems + scratch_elems) * 4
        return int(min(max(2 * need, 16 << 20), 32 << 20))

    # ---- kernel 1: hoisted input projections (both directions, all t) -------
    proj_block_elems = (tm * E + 2 * E * 3 * Hp + 2 * 3 * Hp + 2 * tm * 3 * Hp)
    gif, gib = pl.pallas_call(
        _input_proj_kernel,
        out_shape=(jax.ShapeDtypeStruct((rows_pad, 3 * Hp), jnp.float32),
                   jax.ShapeDtypeStruct((rows_pad, 3 * Hp), jnp.float32)),
        grid_spec=pltpu.PrefetchScalarGridSpec(
            num_scalar_prefetch=0,
            grid=(rows_pad // tm,),
            in_specs=[pl.BlockSpec((tm, E), lambda i: (i, 0)),
                      pl.BlockSpec((E, 3 * Hp), lambda i: (0, 0)),
                      pl.BlockSpec((1, 3 * Hp), lambda i: (0, 0)),
                      pl.BlockSpec((E, 3 * Hp), lambda i: (0, 0)),
                      pl.BlockSpec((1, 3 * Hp), lambda i: (0, 0))],
            out_specs=(pl.BlockSpec((tm, 3 * Hp), lambda i: (i, 0)),
                       pl.BlockSpec((tm, 3 * Hp), lambda i: (i, 0)))),
        compiler_params=pltpu.CompilerParams(
            dimension_semantics=("parallel",),
            vmem_limit_bytes=_vmem_limit(proj_block_elems)),
    )(x, wih_f, bih_f, wih_b, bih_b)

    # ---- kernel 2: streamed bidirectional recurrence ------------------------
    rec_block_elems = (2 * Bt * 3 * Hp + 2 * Hp * 3 * Hp + 2 * Hp
                       + 2 * Bt * Hp + 2 * Bt * Hp)
    rec_scratch_elems = 2 * Bt * Hp
    out_f, out_b, hid = pl.pallas_call(
        _bigru_step_kernel,
        out_shape=(jax.ShapeDtypeStruct((T, Bp, Hp), jnp.float32),
                   jax.ShapeDtypeStruct((T, Bp, Hp), jnp.float32),
                   jax.ShapeDtypeStruct((2, Bp, Hp), jnp.float32)),
        grid_spec=pltpu.PrefetchScalarGridSpec(
            num_scalar_prefetch=0,
            grid=(nb, T),
            in_specs=[
                pl.BlockSpec((Bt, 3 * Hp), lambda b, t: (t * nb + b, 0)),
                pl.BlockSpec((Bt, 3 * Hp), lambda b, t: ((T - 1 - t) * nb + b, 0)),
                pl.BlockSpec((Hp, 3 * Hp), lambda b, t: (0, 0)),
                pl.BlockSpec((Hp, 3 * Hp), lambda b, t: (0, 0)),
                pl.BlockSpec((1, Hp), lambda b, t: (0, 0)),
                pl.BlockSpec((1, Hp), lambda b, t: (0, 0)),
            ],
            out_specs=(
                pl.BlockSpec((1, Bt, Hp), lambda b, t: (t, b, 0)),
                pl.BlockSpec((1, Bt, Hp), lambda b, t: (T - 1 - t, b, 0)),
                pl.BlockSpec((2, Bt, Hp), lambda b, t: (0, b, 0)),
            ),
            scratch_shapes=[pltpu.VMEM((Bt, Hp), jnp.float32),
                            pltpu.VMEM((Bt, Hp), jnp.float32)]),
        compiler_params=pltpu.CompilerParams(
            dimension_semantics=("parallel", "arbitrary"),
            vmem_limit_bytes=_vmem_limit(rec_block_elems, rec_scratch_elems)),
    )(gif, gib, whh_f, whh_b, bhhn_f, bhhn_b)

    # ---- glue: strip padding, back to PyTorch batch_first layout ------------
    # TODO(synk): at production sizes let the consumer take the time-major
    # [T, B, 2H] kernel output directly to skip this extra HBM transpose pass.
    outputs = jnp.transpose(
        jnp.concatenate([out_f[:, :B, :H], out_b[:, :B, :H]], axis=-1), (1, 0, 2))

    h_fwd = hid[0, :B, :H]
    h_bwd = hid[1, :B, :H]
    if mod == 0:
        hid_feat = jnp.concatenate([h_fwd, h_bwd], axis=1)   # [B, 2H]
    else:
        hid_feat = h_fwd + h_bwd                              # hidden.sum(dim=0)
    return hid_feat, outputs


# -----------------------------------------------------------------------------
# Pure-JAX reference (correctness sanity check)
# -----------------------------------------------------------------------------
def encoder_reference(tokens, params, mod):
    emb = params["emb"][tokens]                               # [B, T, E]
    B, T, _ = emb.shape
    H = params["whh_f"].shape[1]

    def cell(x, h, wih, whh, bih, bhh):
        gi = x @ wih.T + bih
        gh = h @ whh.T + bhh
        r = jax.nn.sigmoid(gi[:, :H] + gh[:, :H])
        z = jax.nn.sigmoid(gi[:, H:2 * H] + gh[:, H:2 * H])
        n = jnp.tanh(gi[:, 2 * H:] + r * gh[:, 2 * H:])
        return (1.0 - z) * n + z * h

    h = jnp.zeros((B, H), jnp.float32)
    out_f = []
    for t in range(T):
        h = cell(emb[:, t], h, params["wih_f"], params["whh_f"],
                 params["bih_f"], params["bhh_f"])
        out_f.append(h)
    h_fwd = h

    h = jnp.zeros((B, H), jnp.float32)
    out_b = [None] * T
    for t in range(T - 1, -1, -1):
        h = cell(emb[:, t], h, params["wih_b"], params["whh_b"],
                 params["bih_b"], params["bhh_b"])
        out_b[t] = h
    h_bwd = h

    outputs = jnp.concatenate(
        [jnp.stack(out_f, axis=1), jnp.stack(out_b, axis=1)], axis=-1)
    if mod == 0:
        return jnp.concatenate([h_fwd, h_bwd], axis=1), outputs
    return h_fwd + h_bwd, outputs


# -----------------------------------------------------------------------------
# Deterministic parameter init + demo
# -----------------------------------------------------------------------------
def init_params(key, input_dim, emb_dim, hidden_dim):
    ks = jax.random.split(key, 9)
    s = 1.0 / jnp.sqrt(hidden_dim)
    u = lambda k, shape: jax.random.uniform(k, shape, jnp.float32, -s, s)
    return {
        "emb": jax.random.normal(ks[0], (input_dim, emb_dim), jnp.float32),
        "wih_f": u(ks[1], (3 * hidden_dim, emb_dim)),
        "whh_f": u(ks[2], (3 * hidden_dim, hidden_dim)),
        "bih_f": u(ks[3], (3 * hidden_dim,)),
        "bhh_f": u(ks[4], (3 * hidden_dim,)),
        "wih_b": u(ks[5], (3 * hidden_dim, emb_dim)),
        "whh_b": u(ks[6], (3 * hidden_dim, hidden_dim)),
        "bih_b": u(ks[7], (3 * hidden_dim,)),
        "bhh_b": u(ks[8], (3 * hidden_dim,)),
    }


if __name__ == "__main__":
    INPUT_DIM, EMB_DIM, HIDDEN_DIM = 32, 16, 32   # vocab, emb, hidden
    B, T = 2, 8
    # nn.GRU dropout is a no-op for a single layer (and at inference), so it
    # does not appear in the forward computation.

    key = jax.random.PRNGKey(0)
    pkey, tkey = jax.random.split(key)
    params = init_params(pkey, INPUT_DIM, EMB_DIM, HIDDEN_DIM)
    tokens = jax.random.randint(tkey, (B, T), 0, INPUT_DIM, dtype=jnp.int32)

    for mod in (0, 1):
        hid_feat, outputs = encoder_forward(tokens, params, mod)
        jax.block_until_ready((hid_feat, outputs))

        ref_hid, ref_out = encoder_reference(tokens, params, mod)
        expected_cols = 2 * HIDDEN_DIM if mod == 0 else HIDDEN_DIM
        assert hid_feat.shape == (B, expected_cols)
        assert outputs.shape == (B, T, 2 * HIDDEN_DIM)
        assert jnp.allclose(hid_feat, ref_hid, rtol=1e-4, atol=1e-4)
        assert jnp.allclose(outputs, ref_out, rtol=1e-4, atol=1e-4)

    # bf16 MXU-operand path (recommended on v6e/v7x); gate math / h carry stay f32.
    hid_bf16, out_bf16 = encoder_forward(tokens, params, 0, use_bf16_matmul=True)
    jax.block_until_ready((hid_bf16, out_bf16))
    ref_hid, ref_out = encoder_reference(tokens, params, 0)
    assert jnp.allclose(hid_bf16, ref_hid, rtol=5e-2, atol=5e-2)
    assert jnp.allclose(out_bf16, ref_out, rtol=5e-2, atol=5e-2)

    print("KERNEL_OK")
</pallas_src>

<mosaic_0001>
module attributes {stable_mosaic.version = 11 : i64} {
  func.func @_input_proj_kernel(%arg0: i32, %arg1: memref<64x16xf32, #tpu.memory_space<vmem>>, %arg2: memref<16x384xf32, #tpu.memory_space<vmem>>, %arg3: memref<1x384xf32, #tpu.memory_space<vmem>>, %arg4: memref<16x384xf32, #tpu.memory_space<vmem>>, %arg5: memref<1x384xf32, #tpu.memory_space<vmem>>, %arg6: memref<64x384xf32, #tpu.memory_space<vmem>>, %arg7: memref<64x384xf32, #tpu.memory_space<vmem>>) attributes {dimension_semantics = [#tpu.dimension_semantics<parallel>], iteration_bounds = array<i64: 1>, scalar_prefetch = 0 : i64, scratch_operands = 0 : i64, tpu.core_type = #tpu.core_type<tc>, window_params = [{transform_indices = @transform_0, window_bounds = array<i64: 64, 16>}, {pipeline_mode = #tpu.pipeline_mode<synchronous>, transform_indices = @transform_1, window_bounds = array<i64: 16, 384>}, {pipeline_mode = #tpu.pipeline_mode<synchronous>, transform_indices = @transform_2, window_bounds = array<i64: 1, 384>}, {pipeline_mode = #tpu.pipeline_mode<synchronous>, transform_indices = @transform_3, window_bounds = array<i64: 16, 384>}, {pipeline_mode = #tpu.pipeline_mode<synchronous>, transform_indices = @transform_4, window_bounds = array<i64: 1, 384>}, {transform_indices = @transform_5, window_bounds = array<i64: 64, 384>}, {transform_indices = @transform_6, window_bounds = array<i64: 64, 384>}]} {
    %c0 = arith.constant 0 : index
    %c0_0 = arith.constant 0 : index
    %0 = vector.load %arg1[%c0, %c0_0] : memref<64x16xf32, #tpu.memory_space<vmem>>, vector<64x16xf32>
    %c0_1 = arith.constant 0 : index
    %c0_2 = arith.constant 0 : index
    %1 = vector.load %arg2[%c0_1, %c0_2] : memref<16x384xf32, #tpu.memory_space<vmem>>, vector<16x384xf32>
    %cst = arith.constant dense<0.000000e+00> : vector<64x384xf32>
    %2 = tpu.matmul %0, %1, %cst {dimension_numbers = #tpu.dot_dimension_numbers<[1], [0], [0], [1], [0, 0, 1, 1], [], []>} : vector<64x16xf32>, vector<16x384xf32>, vector<64x384xf32> -> vector<64x384xf32>
    %c0_3 = arith.constant 0 : index
    %c0_4 = arith.constant 0 : index
    %3 = vector.load %arg3[%c0_3, %c0_4] : memref<1x384xf32, #tpu.memory_space<vmem>>, vector<1x384xf32>
    %4 = vector.broadcast %3 : vector<1x384xf32> to vector<64x384xf32>
    %5 = arith.addf %2, %4 : vector<64x384xf32>
    %c0_5 = arith.constant 0 : index
    %c0_6 = arith.constant 0 : index
    %6 = vector.load %arg6[%c0_5, %c0_6] : memref<64x384xf32, #tpu.memory_space<vmem>>, vector<64x384xf32>
    tpu.vector_store %arg6[%c0_5, %c0_6], %5 {strides = array<i32>} : memref<64x384xf32, #tpu.memory_space<vmem>>, vector<64x384xf32>,
    %c0_7 = arith.constant 0 : index
    %c0_8 = arith.constant 0 : index
    %7 = vector.load %arg4[%c0_7, %c0_8] : memref<16x384xf32, #tpu.memory_space<vmem>>, vector<16x384xf32>
    %cst_9 = arith.constant dense<0.000000e+00> : vector<64x384xf32>
    %8 = tpu.matmul %0, %7, %cst_9 {dimension_numbers = #tpu.dot_dimension_numbers<[1], [0], [0], [1], [0, 0, 1, 1], [], []>} : vector<64x16xf32>, vector<16x384xf32>, vector<64x384xf32> -> vector<64x384xf32>
    %c0_10 = arith.constant 0 : index
    %c0_11 = arith.constant 0 : index
    %9 = vector.load %arg5[%c0_10, %c0_11] : memref<1x384xf32, #tpu.memory_space<vmem>>, vector<1x384xf32>
    %10 = vector.broadcast %9 : vector<1x384xf32> to vector<64x384xf32>
    %11 = arith.addf %8, %10 : vector<64x384xf32>
    %c0_12 = arith.constant 0 : index
    %c0_13 = arith.constant 0 : index
    %12 = vector.load %arg7[%c0_12, %c0_13] : memref<64x384xf32, #tpu.memory_space<vmem>>, vector<64x384xf32>
    tpu.vector_store %arg7[%c0_12, %c0_13], %11 {strides = array<i32>} : memref<64x384xf32, #tpu.memory_space<vmem>>, vector<64x384xf32>,
    return
  }
  func.func @transform_0(%arg0: i32) -> (i32, i32) {
    %c0_i32 = arith.constant 0 : i32
    %c0_i32_0 = arith.constant 0 : i32
    return %arg0, %c0_i32 : i32, i32
  }
  func.func @transform_1(%arg0: i32) -> (i32, i32) {
    %c0_i32 = arith.constant 0 : i32
    %c0_i32_0 = arith.constant 0 : i32
    %c0_i32_1 = arith.constant 0 : i32
    return %c0_i32, %c0_i32_0 : i32, i32
  }
  func.func @transform_2(%arg0: i32) -> (i32, i32) {
    %c0_i32 = arith.constant 0 : i32
    %c0_i32_0 = arith.constant 0 : i32
    %c0_i32_1 = arith.constant 0 : i32
    return %c0_i32, %c0_i32_0 : i32, i32
  }
  func.func @transform_3(%arg0: i32) -> (i32, i32) {
    %c0_i32 = arith.constant 0 : i32
    %c0_i32_0 = arith.constant 0 : i32
    %c0_i32_1 = arith.constant 0 : i32
    return %c0_i32, %c0_i32_0 : i32, i32
  }
  func.func @transform_4(%arg0: i32) -> (i32, i32) {
    %c0_i32 = arith.constant 0 : i32
    %c0_i32_0 = arith.constant 0 : i32
    %c0_i32_1 = arith.constant 0 : i32
    return %c0_i32, %c0_i32_0 : i32, i32
  }
  func.func @transform_5(%arg0: i32) -> (i32, i32) {
    %c0_i32 = arith.constant 0 : i32
    %c0_i32_0 = arith.constant 0 : i32
    return %arg0, %c0_i32 : i32, i32
  }
  func.func @transform_6(%arg0: i32) -> (i32, i32) {
    %c0_i32 = arith.constant 0 : i32
    %c0_i32_0 = arith.constant 0 : i32
    return %arg0, %c0_i32 : i32, i32
  }
}

module attributes {stable_mosaic.version = 11 : i64} {
  func.func @_bigru_step_kernel(%arg0: i32, %arg1: i32, %arg2: memref<8x384xf32, #tpu.memory_space<vmem>>, %arg3: memref<8x384xf32, #tpu.memory_space<vmem>>, %arg4: memref<128x384xf32, #tpu.memory_space<vmem>>, %arg5: memref<128x384xf32, #tpu.memory_space<vmem>>, %arg6: memref<1x128xf32, #tpu.memory_space<vmem>>, %arg7: memref<1x128xf32, #tpu.memory_space<vmem>>, %arg8: memref<1x8x128xf32, #tpu.memory_space<vmem>>, %arg9: memref<1x8x128xf32, #tpu.memory_space<vmem>>, %arg10: memref<2x8x128xf32, #tpu.memory_space<vmem>>, %arg11: memref<8x128xf32, #tpu.memory_space<vmem>>, %arg12: memref<8x128xf32, #tpu.memory_space<vmem>>) attributes {dimension_semantics = [#tpu.dimension_semantics<parallel>, #tpu.dimension_semantics<arbitrary>], iteration_bounds = array<i64: 1, 8>, scalar_prefetch = 0 : i64, scratch_operands = 2 : i64, tpu.core_type = #tpu.core_type<tc>, window_params = [{transform_indices = @transform_0, window_bounds = array<i64: 8, 384>}, {transform_indices = @transform_1, window_bounds = array<i64: 8, 384>}, {pipeline_mode = #tpu.pipeline_mode<synchronous>, transform_indices = @transform_2, window_bounds = array<i64: 128, 384>}, {pipeline_mode = #tpu.pipeline_mode<synchronous>, transform_indices = @transform_3, window_bounds = array<i64: 128, 384>}, {pipeline_mode = #tpu.pipeline_mode<synchronous>, transform_indices = @transform_4, window_bounds = array<i64: 1, 128>}, {pipeline_mode = #tpu.pipeline_mode<synchronous>, transform_indices = @transform_5, window_bounds = array<i64: 1, 128>}, {transform_indices = @transform_6, window_bounds = array<i64: 1, 8, 128>}, {transform_indices = @transform_7, window_bounds = array<i64: 1, 8, 128>}, {transform_indices = @transform_8, window_bounds = array<i64: 2, 8, 128>}]} {
    %c0_i32 = arith.constant 0 : i32
    %0 = arith.cmpi eq, %arg1, %c0_i32 : i32
    %1 = arith.extui %0 : i1 to i32
    %c0_i32_0 = arith.constant 0 : i32
    %2 = arith.cmpi ne, %1, %c0_i32_0 : i32
    scf.if %2 {
      %cst_34 = arith.constant 0.000000e+00 : f32
      %80 = vector.broadcast %cst_34 : f32 to vector<8x128xf32>
      %c0_35 = arith.constant 0 : index
      %c0_36 = arith.constant 0 : index
      %81 = vector.load %arg11[%c0_35, %c0_36] : memref<8x128xf32, #tpu.memory_space<vmem>>, vector<8x128xf32>
      tpu.vector_store %arg11[%c0_35, %c0_36], %80 {strides = array<i32>} : memref<8x128xf32, #tpu.memory_space<vmem>>, vector<8x128xf32>,
      %cst_37 = arith.constant 0.000000e+00 : f32
      %82 = vector.broadcast %cst_37 : f32 to vector<8x128xf32>
      %c0_38 = arith.constant 0 : index
      %c0_39 = arith.constant 0 : index
      %83 = vector.load %arg12[%c0_38, %c0_39] : memref<8x128xf32, #tpu.memory_space<vmem>>, vector<8x128xf32>
      tpu.vector_store %arg12[%c0_38, %c0_39], %82 {strides = array<i32>} : memref<8x128xf32, #tpu.memory_space<vmem>>, vector<8x128xf32>,
    } else {
    }
    %c0 = arith.constant 0 : index
    %c0_1 = arith.constant 0 : index
    %3 = vector.load %arg4[%c0, %c0_1] : memref<128x384xf32, #tpu.memory_space<vmem>>, vector<128x384xf32>
    %c0_2 = arith.constant 0 : index
    %c0_3 = arith.constant 0 : index
    %4 = vector.load %arg5[%c0_2, %c0_3] : memref<128x384xf32, #tpu.memory_space<vmem>>, vector<128x384xf32>
    %c0_4 = arith.constant 0 : index
    %c0_5 = arith.constant 0 : index
    %5 = vector.load %arg11[%c0_4, %c0_5] : memref<8x128xf32, #tpu.memory_space<vmem>>, vector<8x128xf32>
    %c0_6 = arith.constant 0 : index
    %c0_7 = arith.constant 0 : index
    %6 = vector.load %arg12[%c0_6, %c0_7] : memref<8x128xf32, #tpu.memory_space<vmem>>, vector<8x128xf32>
    %cst = arith.constant dense<0.000000e+00> : vector<8x384xf32>
    %7 = tpu.matmul %5, %3, %cst {dimension_numbers = #tpu.dot_dimension_numbers<[1], [0], [0], [1], [0, 0, 1, 1], [], []>} : vector<8x128xf32>, vector<128x384xf32>, vector<8x384xf32> -> vector<8x384xf32>
    %cst_8 = arith.constant dense<0.000000e+00> : vector<8x384xf32>
    %8 = tpu.matmul %6, %4, %cst_8 {dimension_numbers = #tpu.dot_dimension_numbers<[1], [0], [0], [1], [0, 0, 1, 1], [], []>} : vector<8x128xf32>, vector<128x384xf32>, vector<8x384xf32> -> vector<8x384xf32>
    %c0_9 = arith.constant 0 : index
    %c0_10 = arith.constant 0 : index
    %9 = vector.load %arg2[%c0_9, %c0_10] : memref<8x384xf32, #tpu.memory_space<vmem>>, vector<8x384xf32>
    %c0_11 = arith.constant 0 : index
    %c0_12 = arith.constant 0 : index
    %10 = vector.load %arg6[%c0_11, %c0_12] : memref<1x128xf32, #tpu.memory_space<vmem>>, vector<1x128xf32>
    %11 = vector.extract_strided_slice %9 {offsets = [0, 0], sizes = [8, 128], strides = [1, 1]} : vector<8x384xf32> to vector<8x128xf32>
    %12 = vector.extract_strided_slice %7 {offsets = [0, 0], sizes = [8, 128], strides = [1, 1]} : vector<8x384xf32> to vector<8x128xf32>
    %13 = arith.addf %11, %12 : vector<8x128xf32>
    %14 = arith.negf %13 : vector<8x128xf32>
    %15 = math.exp %14 : vector<8x128xf32>
    %cst_13 = arith.constant 1.000000e+00 : f32
    %16 = vector.broadcast %cst_13 : f32 to vector<8x128xf32>
    %17 = arith.addf %16, %15 : vector<8x128xf32>
    %18 = arith.divf %16, %17 : vector<8x128xf32>
    %19 = vector.extract_strided_slice %9 {offsets = [0, 128], sizes = [8, 128], strides = [1, 1]} : vector<8x384xf32> to vector<8x128xf32>
    %20 = vector.extract_strided_slice %7 {offsets = [0, 128], sizes = [8, 128], strides = [1, 1]} : vector<8x384xf32> to vector<8x128xf32>
    %21 = arith.addf %19, %20 : vector<8x128xf32>
    %22 = arith.negf %21 : vector<8x128xf32>
    %23 = math.exp %22 : vector<8x128xf32>
    %cst_14 = arith.constant 1.000000e+00 : f32
    %24 = vector.broadcast %cst_14 : f32 to vector<8x128xf32>
    %25 = arith.addf %24, %23 : vector<8x128xf32>
    %26 = arith.divf %24, %25 : vector<8x128xf32>
    %27 = vector.extract_strided_slice %9 {offsets = [0, 256], sizes = [8, 128], strides = [1, 1]} : vector<8x384xf32> to vector<8x128xf32>
    %28 = vector.extract_strided_slice %7 {offsets = [0, 256], sizes = [8, 128], strides = [1, 1]} : vector<8x384xf32> to vector<8x128xf32>
    %29 = vector.broadcast %10 : vector<1x128xf32> to vector<8x128xf32>
    %30 = arith.addf %28, %29 : vector<8x128xf32>
    %31 = arith.mulf %18, %30 : vector<8x128xf32>
    %32 = arith.addf %27, %31 : vector<8x128xf32>
    %33 = math.tanh %32 : vector<8x128xf32>
    %cst_15 = arith.constant 1.000000e+00 : f32
    %34 = vector.broadcast %cst_15 : f32 to vector<8x128xf32>
    %35 = arith.subf %34, %26 : vector<8x128xf32>
    %36 = arith.mulf %35, %33 : vector<8x128xf32>
    %37 = arith.mulf %26, %5 : vector<8x128xf32>
    %38 = arith.addf %36, %37 : vector<8x128xf32>
    %c0_16 = arith.constant 0 : index
    %c0_17 = arith.constant 0 : index
    %39 = vector.load %arg3[%c0_16, %c0_17] : memref<8x384xf32, #tpu.memory_space<vmem>>, vector<8x384xf32>
    %c0_18 = arith.constant 0 : index
    %c0_19 = arith.constant 0 : index
    %40 = vector.load %arg7[%c0_18, %c0_19] : memref<1x128xf32, #tpu.memory_space<vmem>>, vector<1x128xf32>
    %41 = vector.extract_strided_slice %39 {offsets = [0, 0], sizes = [8, 128], strides = [1, 1]} : vector<8x384xf32> to vector<8x128xf32>
    %42 = vector.extract_strided_slice %8 {offsets = [0, 0], sizes = [8, 128], strides = [1, 1]} : vector<8x384xf32> to vector<8x128xf32>
    %43 = arith.addf %41, %42 : vector<8x128xf32>
    %44 = arith.negf %43 : vector<8x128xf32>
    %45 = math.exp %44 : vector<8x128xf32>
    %cst_20 = arith.constant 1.000000e+00 : f32
    %46 = vector.broadcast %cst_20 : f32 to vector<8x128xf32>
    %47 = arith.addf %46, %45 : vector<8x128xf32>
    %48 = arith.divf %46, %47 : vector<8x128xf32>
    %49 = vector.extract_strided_slice %39 {offsets = [0, 128], sizes = [8, 128], strides = [1, 1]} : vector<8x384xf32> to vector<8x128xf32>
    %50 = vector.extract_strided_slice %8 {offsets = [0, 128], sizes = [8, 128], strides = [1, 1]} : vector<8x384xf32> to vector<8x128xf32>
    %51 = arith.addf %49, %50 : vector<8x128xf32>
    %52 = arith.negf %51 : vector<8x128xf32>
    %53 = math.exp %52 : vector<8x128xf32>
    %cst_21 = arith.constant 1.000000e+00 : f32
    %54 = vector.broadcast %cst_21 : f32 to vector<8x128xf32>
    %55 = arith.addf %54, %53 : vector<8x128xf32>
    %56 = arith.divf %54, %55 : vector<8x128xf32>
    %57 = vector.extract_strided_slice %39 {offsets = [0, 256], sizes = [8, 128], strides = [1, 1]} : vector<8x384xf32> to vector<8x128xf32>
    %58 = vector.extract_strided_slice %8 {offsets = [0, 256], sizes = [8, 128], strides = [1, 1]} : vector<8x384xf32> to vector<8x128xf32>
    %59 = vector.broadcast %40 : vector<1x128xf32> to vector<8x128xf32>
    %60 = arith.addf %58, %59 : vector<8x128xf32>
    %61 = arith.mulf %48, %60 : vector<8x128xf32>
    %62 = arith.addf %57, %61 : vector<8x128xf32>
    %63 = math.tanh %62 : vector<8x128xf32>
    %cst_22 = arith.constant 1.000000e+00 : f32
    %64 = vector.broadcast %cst_22 : f32 to vector<8x128xf32>
    %65 = arith.subf %64, %56 : vector<8x128xf32>
    %66 = arith.mulf %65, %63 : vector<8x128xf32>
    %67 = arith.mulf %56, %6 : vector<8x128xf32>
    %68 = arith.addf %66, %67 : vector<8x128xf32>
    %c0_23 = arith.constant 0 : index
    %c0_24 = arith.constant 0 : index
    %69 = vector.load %arg11[%c0_23, %c0_24] : memref<8x128xf32, #tpu.memory_space<vmem>>, vector<8x128xf32>
    tpu.vector_store %arg11[%c0_23, %c0_24], %38 {strides = array<i32>} : memref<8x128xf32, #tpu.memory_space<vmem>>, vector<8x128xf32>,
    %c0_25 = arith.constant 0 : index
    %c0_26 = arith.constant 0 : index
    %70 = vector.load %arg12[%c0_25, %c0_26] : memref<8x128xf32, #tpu.memory_space<vmem>>, vector<8x128xf32>
    tpu.vector_store %arg12[%c0_25, %c0_26], %68 {strides = array<i32>} : memref<8x128xf32, #tpu.memory_space<vmem>>, vector<8x128xf32>,
    %c0_27 = arith.constant 0 : index
    %c0_28 = arith.constant 0 : index
    %c0_29 = arith.constant 0 : index
    %71 = vector.load %arg8[%c0_27, %c0_28, %c0_29] : memref<1x8x128xf32, #tpu.memory_space<vmem>>, vector<1x8x128xf32>
    %72 = vector.shape_cast %71 : vector<1x8x128xf32> to vector<8x128xf32>
    %73 = vector.shape_cast %38 : vector<8x128xf32> to vector<1x8x128xf32>
    tpu.vector_store %arg8[%c0_27, %c0_28, %c0_29], %73 {strides = array<i32>} : memref<1x8x128xf32, #tpu.memory_space<vmem>>, vector<1x8x128xf32>,
    %c0_30 = arith.constant 0 : index
    %c0_31 = arith.constant 0 : index
    %c0_32 = arith.constant 0 : index
    %74 = vector.load %arg9[%c0_30, %c0_31, %c0_32] : memref<1x8x128xf32, #tpu.memory_space<vmem>>, vector<1x8x128xf32>
    %75 = vector.shape_cast %74 : vector<1x8x128xf32> to vector<8x128xf32>
    %76 = vector.shape_cast %68 : vector<8x128xf32> to vector<1x8x128xf32>
    tpu.vector_store %arg9[%c0_30, %c0_31, %c0_32], %76 {strides = array<i32>} : memref<1x8x128xf32, #tpu.memory_space<vmem>>, vector<1x8x128xf32>,
    %c7_i32 = arith.constant 7 : i32
    %77 = arith.cmpi eq, %arg1, %c7_i32 : i32
    %78 = arith.extui %77 : i1 to i32
    %c0_i32_33 = arith.constant 0 : i32
    %79 = arith.cmpi ne, %78, %c0_i32_33 : i32
    scf.if %79 {
      %c0_34 = arith.constant 0 : index
      %c0_35 = arith.constant 0 : index
      %c0_36 = arith.constant 0 : index
      %80 = vector.load %arg10[%c0_34, %c0_35, %c0_36] : memref<2x8x128xf32, #tpu.memory_space<vmem>>, vector<1x8x128xf32>
      %81 = vector.shape_cast %80 : vector<1x8x128xf32> to vector<8x128xf32>
      %82 = vector.shape_cast %38 : vector<8x128xf32> to vector<1x8x128xf32>
      tpu.vector_store %arg10[%c0_34, %c0_35, %c0_36], %82 {strides = array<i32>} : memref<2x8x128xf32, #tpu.memory_space<vmem>>, vector<1x8x128xf32>,
      %c1 = arith.constant 1 : index
      %c0_37 = arith.constant 0 : index
      %c0_38 = arith.constant 0 : index
      %83 = vector.load %arg10[%c1, %c0_37, %c0_38] : memref<2x8x128xf32, #tpu.memory_space<vmem>>, vector<1x8x128xf32>
      %84 = vector.shape_cast %83 : vector<1x8x128xf32> to vector<8x128xf32>
      %85 = vector.shape_cast %68 : vector<8x128xf32> to vector<1x8x128xf32>
      tpu.vector_store %arg10[%c1, %c0_37, %c0_38], %85 {strides = array<i32>} : memref<2x8x128xf32, #tpu.memory_space<vmem>>, vector<1x8x128xf32>,
    } else {
    }
    return
  }
  func.func @transform_0(%arg0: i32, %arg1: i32) -> (i32, i32) {
    %c1_i32 = arith.constant 1 : i32
    %0 = arith.muli %arg1, %c1_i32 : i32
    %1 = arith.addi %0, %arg0 : i32
    %c0_i32 = arith.constant 0 : i32
    %c0_i32_0 = arith.constant 0 : i32
    return %1, %c0_i32 : i32, i32
  }
  func.func @transform_1(%arg0: i32, %arg1: i32) -> (i32, i32) {
    %c7_i32 = arith.constant 7 : i32
    %0 = arith.subi %c7_i32, %arg1 : i32
    %c1_i32 = arith.constant 1 : i32
    %1 = arith.muli %0, %c1_i32 : i32
    %2 = arith.addi %1, %arg0 : i32
    %c0_i32 = arith.constant 0 : i32
    %c0_i32_0 = arith.constant 0 : i32
    return %2, %c0_i32 : i32, i32
  }
  func.func @transform_2(%arg0: i32, %arg1: i32) -> (i32, i32) {
    %c0_i32 = arith.constant 0 : i32
    %c0_i32_0 = arith.constant 0 : i32
    %c0_i32_1 = arith.constant 0 : i32
    return %c0_i32, %c0_i32_0 : i32, i32
  }
  func.func @transform_3(%arg0: i32, %arg1: i32) -> (i32, i32) {
    %c0_i32 = arith.constant 0 : i32
    %c0_i32_0 = arith.constant 0 : i32
    %c0_i32_1 = arith.constant 0 : i32
    return %c0_i32, %c0_i32_0 : i32, i32
  }
  func.func @transform_4(%arg0: i32, %arg1: i32) -> (i32, i32) {
    %c0_i32 = arith.constant 0 : i32
    %c0_i32_0 = arith.constant 0 : i32
    %c0_i32_1 = arith.constant 0 : i32
    return %c0_i32, %c0_i32_0 : i32, i32
  }
  func.func @transform_5(%arg0: i32, %arg1: i32) -> (i32, i32) {
    %c0_i32 = arith.constant 0 : i32
    %c0_i32_0 = arith.constant 0 : i32
    %c0_i32_1 = arith.constant 0 : i32
    return %c0_i32, %c0_i32_0 : i32, i32
  }
  func.func @transform_6(%arg0: i32, %arg1: i32) -> (i32, i32, i32) {
    %c0_i32 = arith.constant 0 : i32
    %c0_i32_0 = arith.constant 0 : i32
    return %arg1, %arg0, %c0_i32 : i32, i32, i32
  }
  func.func @transform_7(%arg0: i32, %arg1: i32) -> (i32, i32, i32) {
    %c7_i32 = arith.constant 7 : i32
    %0 = arith.subi %c7_i32, %arg1 : i32
    %c0_i32 = arith.constant 0 : i32
    %c0_i32_0 = arith.constant 0 : i32
    return %0, %arg0, %c0_i32 : i32, i32, i32
  }
  func.func @transform_8(%arg0: i32, %arg1: i32) -> (i32, i32, i32) {
    %c0_i32 = arith.constant 0 : i32
    %c0_i32_0 = arith.constant 0 : i32
    %c0_i32_1 = arith.constant 0 : i32
    return %c0_i32, %arg0, %c0_i32_0 : i32, i32, i32
  }
}

</mosaic_0001>

<bundles_post_ra>
// kernel: encoder_forward.2
= control target key start
LH: loop header
LB: loop body
LE: loop exit
PB: predicated region body
PF: predicated region fallthrough
CT: control target
= control target key end

     0   :  { %v694_v3 = vmov 0.0   ;;  %vm53_vm0 = vcmask 130048   ;;  %v38_v27 = vlaneseq  ;;  %s1037_s1 = inlined_call_operand.vmem [shape: f32[16,384], index: 1, kind: input, shape index: {}]   ;;  %s1038_s0 = inlined_call_operand.vmem [shape: f32[64,16], index: 0, kind: input, shape index: {}]   ;;  %s1039_s3 = inlined_call_operand.vmem [shape: f32[16,384], index: 3, kind: input, shape index: {}]   ;;  %s1040_s2 = inlined_call_operand.vmem [shape: f32[1,384], index: 2, kind: input, shape index: {}]   ;;  %s1041_s5 = inlined_call_operand.vmem [shape: f32[64,384], index: 5, kind: output, shape index: {0}]   ;;  %s1042_s4 = inlined_call_operand.vmem [shape: f32[1,384], index: 4, kind: input, shape index: {}]   ;;  %s1043_s6 = inlined_call_operand.vmem [shape: f32[64,384], index: 6, kind: output, shape index: {1}]  }
   0x1   :  { %v31_v0 = vld [vmem:[%s1037_s1 + $0x8] sm:$0xff]  ;;  %v34_v1 = vld [vmem:[%s1037_s1 + $0x20] sm:$0xff]  ;;  %v32_v2 = vld [vmem:[%s1037_s1 + $0x10] sm:$0xff]  ;;  %142 = vmatprep.mubr.f32.mxu0 %v694_v3 }
   0x2   :  { %v677_v4 = vpack.c.bf16 %v34_v1, %v31_v0  ;;  %v35_v5 = vld [vmem:[%s1037_s1 + $0x28] sm:$0xff]  ;;  %v30_v6 = vld [vmem:[%s1037_s1] sm:$0xff]  ;;  %v33_v7 = vld [vmem:[%s1037_s1 + $0x18] sm:$0xff]  ;;  %v838_v28 = vshrl.u32 %v38_v27, 7 }
   0x3   :  { %v681_v8 = vpack.c.bf16 %v35_v5, %v32_v2  ;;  %v679_v9 = vpack.c.bf16 %v33_v7, %v30_v6  ;;  %v22_v10 = vld [vmem:[%s1038_s0] sm:$0xff]  ;;  %v321_v11 = vld [vmem:[%s1039_s3 + $0x8] sm:$0xff]  ;;  %v322_v13 = vld [vmem:[%s1039_s3 + $0x10] sm:$0xff] }
   0x4   :  { %678 = vmatprep.subr.bf16.mxu0 %v677_v4  ;;  %649 = vmatprep.mubr.msk.f32.mxu1 %vm53_vm0, %v22_v10  ;;  %v324_v12 = vld [vmem:[%s1039_s3 + $0x20] sm:$0xff]  ;;  %v325_v14 = vld [vmem:[%s1039_s3 + $0x28] sm:$0xff]  ;;  %v323_v18 = vld [vmem:[%s1039_s3 + $0x18] sm:$0xff]  ;;  %v40_v29 = vsub.s32 0, %v838_v28  ;;  %v48_v31 = vsub.s32 2, %v838_v28  ;;  %v44_v32 = vsub.s32 1, %v838_v28 }
   0x5   :  { %682 = vmatprep.subr.bf16.mxu1 %v681_v8  ;;  %680 = vmatpush1.bf16.msra.mxu0 %v679_v9  ;;  %v685_v15 = vpack.c.bf16 %v324_v12, %v321_v11  ;;  %v689_v16 = vpack.c.bf16 %v325_v14, %v322_v13  ;;  %v320_v17 = vld [vmem:[%s1039_s3] sm:$0xff]  ;;  %v23_v19 = vld [vmem:[%s1038_s0 + $0x8] sm:$0xff]  ;;  %v24_v21 = vld [vmem:[%s1038_s0 + $0x10] sm:$0xff] }
   0x6   :  { %684 = vmatpush3.bf16.msra.mxu1 %v681_v8  ;;  %v687_v20 = vpack.c.bf16 %v323_v18, %v320_v17  ;;  %v25_v22 = vld [vmem:[%s1038_s0 + $0x18] sm:$0xff]  ;;  %v26_v23 = vld [vmem:[%s1038_s0 + $0x20] sm:$0xff]  ;;  %v27_v24 = vld [vmem:[%s1038_s0 + $0x28] sm:$0xff] }
   0x7   :  { %686 = vmatprep.subr.bf16.mxu1 %v685_v15  ;;  %690 = vmatprep.subr.bf16.mxu0 %v689_v16  ;;  %v28_v25 = vld [vmem:[%s1038_s0 + $0x30] sm:$0xff]  ;;  %v29_v26 = vld [vmem:[%s1038_s0 + $0x38] sm:$0xff]  ;;  %v36_v30 = vld [vmem:[%s1040_s2] sm:$0x7] }
   0x8   :  { %593 = vmatmul.mubr.msk.f32.vlgmr.msra.gmra.mrb[0].mxu0 %vm53_vm0, %v22_v10  ;;  %v846_v33 = vrot.slane %v36_v30, %v40_v29  ;;  %v49_v34 = vrot.slane %v36_v30, %v48_v31  ;;  %v850_v35 = vrot.slane %v36_v30, %v44_v32  ;;  %v326_v60 = vld [vmem:[%s1042_s4] sm:$0x7] }
   0x9   :  { %650 = vmatmul.mubr.msk.f32.vlgmr.msra.gmra.mrb[0].mxu1 %vm53_vm0, %v23_v19  ;;  %692 = vmatpush3.bf16.msra.mxu0 %v689_v16  ;;  %v899_v4 = vrot.slane %v326_v60, %v40_v29  ;;  %v904_v6 = vrot.slane %v326_v60, %v44_v32 }
   0xa   :  { %688 = vmatpush1.bf16.msra.mxu1 %v687_v20  ;;  %148 = vmatprep.mubr.f32.mxu0 %v694_v3 }
   0xb   :  { %652 = vmatprep.mubr.msk.f32.mxu1 %vm53_vm0, %v24_v21 }
   0xc   :  { %594 = vmatmul.mubr.msk.f32.gmra.mrb[2].mxu0 %vm53_vm0, %v23_v19 }
   0xd   :  { %653 = vmatmul.mubr.msk.f32.gmra.mrb[2].mxu1 %vm53_vm0, %v25_v22  ;;  %154 = vmatprep.mubr.f32.mxu0 %v694_v3 }
   0xe   :  { %655 = vmatprep.mubr.msk.f32.mxu1 %vm53_vm0, %v26_v23 }
  0x10   :  { %595 = vmatmul.mubr.msk.f32.gmra.mrb[4].mxu0 %vm53_vm0, %v24_v21 }
  0x11   :  { %656 = vmatmul.mubr.msk.f32.gmra.mrb[4].mxu1 %vm53_vm0, %v27_v24  ;;  %160 = vmatprep.mubr.f32.mxu0 %v694_v3 }
  0x12   :  { %658 = vmatprep.mubr.msk.f32.mxu1 %vm53_vm0, %v28_v25 }
  0x14   :  { %596 = vmatmul.mubr.msk.f32.gmra.mrb[6].mxu0 %vm53_vm0, %v25_v22 }
  0x15   :  { %659 = vmatmul.mubr.msk.f32.gmra.mrb[6].mxu1 %vm53_vm0, %v29_v26  ;;  %166 = vmatprep.mubr.f32.mxu0 %v694_v3 }
  0x16   :  { %407 = vmatprep.mubr.f32.mxu1 %v694_v3 }
  0x18   :  { %597 = vmatmul.mubr.msk.f32.gmra.mrb[8].mxu0 %vm53_vm0, %v26_v23 }
  0x19   :  { %609 = vmatmul.mubr.msk.f32.vlgmr.msra.gmra.mrb[8].mxu1 %vm53_vm0, %v22_v10  ;;  %172 = vmatprep.mubr.f32.mxu0 %v694_v3 }
  0x1a   :  { %413 = vmatprep.mubr.f32.mxu1 %v694_v3 }
  0x1c   :  { %598 = vmatmul.mubr.msk.f32.gmra.mrb[10].mxu0 %vm53_vm0, %v27_v24 }
  0x1d   :  { %610 = vmatmul.mubr.msk.f32.gmra.mrb[10].mxu1 %vm53_vm0, %v23_v19  ;;  %178 = vmatprep.mubr.f32.mxu0 %v694_v3 }
  0x1e   :  { %419 = vmatprep.mubr.f32.mxu1 %v694_v3 }
  0x20   :  { %599 = vmatmul.mubr.msk.f32.gmra.mrb[12].mxu0 %vm53_vm0, %v28_v25 }
  0x21   :  { %611 = vmatmul.mubr.msk.f32.gmra.mrb[12].mxu1 %vm53_vm0, %v24_v21  ;;  %184 = vmatprep.mubr.f32.mxu0 %v694_v3 }
  0x22   :  { %425 = vmatprep.mubr.f32.mxu1 %v694_v3 }
  0x24   :  { %600 = vmatmul.mubr.msk.f32.gmra.mrb[14].mxu0 %vm53_vm0, %v29_v26 }
  0x25   :  { %612 = vmatmul.mubr.msk.f32.gmra.mrb[14].mxu1 %vm53_vm0, %v25_v22  ;;  %665 = vmatprep.mubr.msk.f32.mxu0 %vm53_vm0, %v22_v10 }
  0x26   :  { %431 = vmatprep.mubr.f32.mxu1 %v694_v3 }
  0x28   :  { %666 = vmatmul.mubr.msk.f32.vlgmr.msra.gmra.mrb[16].mxu0 %vm53_vm0, %v23_v19 }
  0x29   :  { %613 = vmatmul.mubr.msk.f32.gmra.mrb[16].mxu1 %vm53_vm0, %v26_v23  ;;  %668 = vmatprep.mubr.msk.f32.mxu0 %vm53_vm0, %v24_v21 }
  0x2a   :  { %437 = vmatprep.mubr.f32.mxu1 %v694_v3 }
  0x2c   :  { %669 = vmatmul.mubr.msk.f32.gmra.mrb[18].mxu0 %vm53_vm0, %v25_v22 }
  0x2d   :  { %614 = vmatmul.mubr.msk.f32.gmra.mrb[18].mxu1 %vm53_vm0, %v27_v24  ;;  %671 = vmatprep.mubr.msk.f32.mxu0 %vm53_vm0, %v26_v23 }
  0x2e   :  { %443 = vmatprep.mubr.f32.mxu1 %v694_v3 }
  0x30   :  { %672 = vmatmul.mubr.msk.f32.gmra.mrb[20].mxu0 %vm53_vm0, %v27_v24 }
  0x31   :  { %615 = vmatmul.mubr.msk.f32.gmra.mrb[20].mxu1 %vm53_vm0, %v28_v25  ;;  %674 = vmatprep.mubr.msk.f32.mxu0 %vm53_vm0, %v28_v25 }
  0x32   :  { %449 = vmatprep.mubr.f32.mxu1 %v694_v3 }
  0x34   :  { %675 = vmatmul.mubr.msk.f32.gmra.mrb[22].mxu0 %vm53_vm0, %v29_v26 }
  0x35   :  { %616 = vmatmul.mubr.msk.f32.gmra.mrb[22].mxu1 %vm53_vm0, %v29_v26 }
  0xdb   :  { %v144_v36 = vpop.f32.mrb[0].mxu0 }
  0xdc   :  { %v145_v37 = vadd.f32 %v144_v36, %v846_v33  ;;  %v651_v38 = vpop.f32.mrb[0].mxu1  ;;  %v146_v39 = vpop.f32.mrb[1].mxu0 }
  0xdd   :  { %v263_v40 = vadd.f32 %v651_v38, %v49_v34  ;;  %v147_v41 = vadd.f32 %v146_v39, %v850_v35  ;;  %v257_v42 = vpop.f32.mrb[1].mxu1  ;;  %v339_v39 = vrot.slane %v326_v60, %v48_v31 }
  0xde   :  { %296 = vst [vmem:[%s1041_s5] sm:$0xff] %v145_v37  ;;  %v258_v43 = vadd.f32 %v257_v42, %v49_v34 }
  0xdf   :  { %301 = vst [vmem:[%s1041_s5 + $0x28] sm:$0xff] %v263_v40  ;;  %297 = vst [vmem:[%s1041_s5 + $0x8] sm:$0xff] %v147_v41  ;;  %v150_v44 = vpop.f32.mrb[2].mxu0 }
  0xe0   :  { %298 = vst [vmem:[%s1041_s5 + $0x10] sm:$0xff] %v258_v43  ;;  %v151_v45 = vadd.f32 %v150_v44, %v846_v33  ;;  %v654_v46 = vpop.f32.mrb[2].mxu1  ;;  %v152_v47 = vpop.f32.mrb[3].mxu0 }
  0xe1   :  { %v273_v48 = vadd.f32 %v654_v46, %v49_v34  ;;  %v153_v49 = vadd.f32 %v152_v47, %v850_v35  ;;  %v267_v50 = vpop.f32.mrb[3].mxu1 }
  0xe2   :  { %299 = vst [vmem:[%s1041_s5 + $0x18] sm:$0xff] %v151_v45  ;;  %v268_v51 = vadd.f32 %v267_v50, %v49_v34 }
  0xe3   :  { %307 = vst [vmem:[%s1041_s5 + $0x58] sm:$0xff] %v273_v48  ;;  %300 = vst [vmem:[%s1041_s5 + $0x20] sm:$0xff] %v153_v49  ;;  %v156_v52 = vpop.f32.mrb[4].mxu0 }
  0xe4   :  { %304 = vst [vmem:[%s1041_s5 + $0x40] sm:$0xff] %v268_v51  ;;  %v157_v53 = vadd.f32 %v156_v52, %v846_v33  ;;  %v657_v54 = vpop.f32.mrb[4].mxu1  ;;  %v158_v55 = vpop.f32.mrb[5].mxu0 }
  0xe5   :  { %v283_v56 = vadd.f32 %v657_v54, %v49_v34  ;;  %v159_v57 = vadd.f32 %v158_v55, %v850_v35  ;;  %v277_v58 = vpop.f32.mrb[5].mxu1 }
  0xe6   :  { %302 = vst [vmem:[%s1041_s5 + $0x30] sm:$0xff] %v157_v53  ;;  %v278_v59 = vadd.f32 %v277_v58, %v49_v34 }
  0xe7   :  { %313 = vst [vmem:[%s1041_s5 + $0x88] sm:$0xff] %v283_v56  ;;  %303 = vst [vmem:[%s1041_s5 + $0x38] sm:$0xff] %v159_v57  ;;  %v162_v61 = vpop.f32.mrb[6].mxu0 }
  0xe8   :  { %310 = vst [vmem:[%s1041_s5 + $0x70] sm:$0xff] %v278_v59  ;;  %v163_v62 = vadd.f32 %v162_v61, %v846_v33  ;;  %v660_v63 = vpop.f32.mrb[6].mxu1  ;;  %v164_v0 = vpop.f32.mrb[7].mxu0 }
  0xe9   :  { %v293_v1 = vadd.f32 %v660_v63, %v49_v34  ;;  %v165_v2 = vadd.f32 %v164_v0, %v850_v35  ;;  %v287_v3 = vpop.f32.mrb[7].mxu1 }
  0xea   :  { %305 = vst [vmem:[%s1041_s5 + $0x48] sm:$0xff] %v163_v62  ;;  %v288_v5 = vadd.f32 %v287_v3, %v49_v34 }
  0xeb   :  { %319 = vst [vmem:[%s1041_s5 + $0xb8] sm:$0xff] %v293_v1  ;;  %306 = vst [vmem:[%s1041_s5 + $0x50] sm:$0xff] %v165_v2  ;;  %v168_v7 = vpop.f32.mrb[8].mxu0 }
  0xec   :  { %316 = vst [vmem:[%s1041_s5 + $0xa0] sm:$0xff] %v288_v5  ;;  %v169_v8 = vadd.f32 %v168_v7, %v846_v33  ;;  %v409_v9 = vpop.f32.mrb[8].mxu1  ;;  %v170_v10 = vpop.f32.mrb[9].mxu0 }
  0xed   :  { %v410_v11 = vadd.f32 %v409_v9, %v899_v4  ;;  %v171_v12 = vadd.f32 %v170_v10, %v850_v35  ;;  %v411_v13 = vpop.f32.mrb[9].mxu1 }
  0xee   :  { %308 = vst [vmem:[%s1041_s5 + $0x60] sm:$0xff] %v169_v8  ;;  %v412_v14 = vadd.f32 %v411_v13, %v904_v6 }
  0xef   :  { %561 = vst [vmem:[%s1043_s6] sm:$0xff] %v410_v11  ;;  %309 = vst [vmem:[%s1041_s5 + $0x68] sm:$0xff] %v171_v12  ;;  %v174_v15 = vpop.f32.mrb[10].mxu0 }
  0xf0   :  { %562 = vst [vmem:[%s1043_s6 + $0x8] sm:$0xff] %v412_v14  ;;  %v175_v16 = vadd.f32 %v174_v15, %v846_v33  ;;  %v415_v17 = vpop.f32.mrb[10].mxu1  ;;  %v176_v18 = vpop.f32.mrb[11].mxu0 }
  0xf1   :  { %v416_v19 = vadd.f32 %v415_v17, %v899_v4  ;;  %v177_v20 = vadd.f32 %v176_v18, %v850_v35  ;;  %v417_v21 = vpop.f32.mrb[11].mxu1 }
  0xf2   :  { %311 = vst [vmem:[%s1041_s5 + $0x78] sm:$0xff] %v175_v16  ;;  %v418_v22 = vadd.f32 %v417_v21, %v904_v6 }
  0xf3   :  { %564 = vst [vmem:[%s1043_s6 + $0x18] sm:$0xff] %v416_v19  ;;  %312 = vst [vmem:[%s1041_s5 + $0x80] sm:$0xff] %v177_v20  ;;  %v180_v23 = vpop.f32.mrb[12].mxu0 }
  0xf4   :  { %565 = vst [vmem:[%s1043_s6 + $0x20] sm:$0xff] %v418_v22  ;;  %v181_v24 = vadd.f32 %v180_v23, %v846_v33  ;;  %v421_v25 = vpop.f32.mrb[12].mxu1  ;;  %v182_v26 = vpop.f32.mrb[13].mxu0 }
  0xf5   :  { %v422_v27 = vadd.f32 %v421_v25, %v899_v4  ;;  %v183_v29 = vadd.f32 %v182_v26, %v850_v35  ;;  %v423_v30 = vpop.f32.mrb[13].mxu1 }
  0xf6   :  { %314 = vst [vmem:[%s1041_s5 + $0x90] sm:$0xff] %v181_v24  ;;  %v424_v32 = vadd.f32 %v423_v30, %v904_v6 }
  0xf7   :  { %567 = vst [vmem:[%s1043_s6 + $0x30] sm:$0xff] %v422_v27  ;;  %315 = vst [vmem:[%s1041_s5 + $0x98] sm:$0xff] %v183_v29  ;;  %v186_v34 = vpop.f32.mrb[14].mxu0 }
  0xf8   :  { %568 = vst [vmem:[%s1043_s6 + $0x38] sm:$0xff] %v424_v32  ;;  %v187_v36 = vadd.f32 %v186_v34, %v846_v33  ;;  %v427_v37 = vpop.f32.mrb[14].mxu1  ;;  %v188_v38 = vpop.f32.mrb[15].mxu0 }
  0xf9   :  { %v428_v40 = vadd.f32 %v427_v37, %v899_v4  ;;  %v189_v41 = vadd.f32 %v188_v38, %v850_v35  ;;  %v429_v42 = vpop.f32.mrb[15].mxu1 }
  0xfa   :  { %317 = vst [vmem:[%s1041_s5 + $0xa8] sm:$0xff] %v187_v36  ;;  %v430_v43 = vadd.f32 %v429_v42, %v904_v6 }
  0xfb   :  { %570 = vst [vmem:[%s1043_s6 + $0x48] sm:$0xff] %v428_v40  ;;  %318 = vst [vmem:[%s1041_s5 + $0xb0] sm:$0xff] %v189_v41  ;;  %v667_v28 = vpop.f32.mrb[16].mxu0 }
  0xfc   :  { %571 = vst [vmem:[%s1043_s6 + $0x50] sm:$0xff] %v430_v43  ;;  %v433_v31 = vpop.f32.mrb[16].mxu1  ;;  %v528_v33 = vadd.f32 %v667_v28, %v339_v39  ;;  %v522_v35 = vpop.f32.mrb[17].mxu0 }
  0xfd   :  { %v434_v44 = vadd.f32 %v433_v31, %v899_v4  ;;  %v435_v45 = vpop.f32.mrb[17].mxu1  ;;  %v523_v46 = vadd.f32 %v522_v35, %v339_v39 }
  0xfe   :  { %566 = vst [vmem:[%s1043_s6 + $0x28] sm:$0xff] %v528_v33  ;;  %v436_v47 = vadd.f32 %v435_v45, %v904_v6 }
  0xff   :  { %573 = vst [vmem:[%s1043_s6 + $0x60] sm:$0xff] %v434_v44  ;;  %563 = vst [vmem:[%s1043_s6 + $0x10] sm:$0xff] %v523_v46  ;;  %v670_v48 = vpop.f32.mrb[18].mxu0 }
 0x100   :  { %574 = vst [vmem:[%s1043_s6 + $0x68] sm:$0xff] %v436_v47  ;;  %v439_v49 = vpop.f32.mrb[18].mxu1  ;;  %v538_v50 = vadd.f32 %v670_v48, %v339_v39  ;;  %v532_v51 = vpop.f32.mrb[19].mxu0 }
 0x101   :  { %v440_v52 = vadd.f32 %v439_v49, %v899_v4  ;;  %v441_v53 = vpop.f32.mrb[19].mxu1  ;;  %v533_v54 = vadd.f32 %v532_v51, %v339_v39 }
 0x102   :  { %572 = vst [vmem:[%s1043_s6 + $0x58] sm:$0xff] %v538_v50  ;;  %v442_v55 = vadd.f32 %v441_v53, %v904_v6 }
 0x103   :  { %576 = vst [vmem:[%s1043_s6 + $0x78] sm:$0xff] %v440_v52  ;;  %569 = vst [vmem:[%s1043_s6 + $0x40] sm:$0xff] %v533_v54  ;;  %v673_v56 = vpop.f32.mrb[20].mxu0 }
 0x104   :  { %577 = vst [vmem:[%s1043_s6 + $0x80] sm:$0xff] %v442_v55  ;;  %v445_v57 = vpop.f32.mrb[20].mxu1  ;;  %v548_v58 = vadd.f32 %v673_v56, %v339_v39  ;;  %v542_v59 = vpop.f32.mrb[21].mxu0 }
 0x105   :  { %v446_v60 = vadd.f32 %v445_v57, %v899_v4  ;;  %v447_v61 = vpop.f32.mrb[21].mxu1  ;;  %v543_v62 = vadd.f32 %v542_v59, %v339_v39 }
 0x106   :  { %578 = vst [vmem:[%s1043_s6 + $0x88] sm:$0xff] %v548_v58  ;;  %v448_v63 = vadd.f32 %v447_v61, %v904_v6 }
 0x107   :  { %579 = vst [vmem:[%s1043_s6 + $0x90] sm:$0xff] %v446_v60  ;;  %575 = vst [vmem:[%s1043_s6 + $0x70] sm:$0xff] %v543_v62  ;;  %v676_v0 = vpop.f32.mrb[22].mxu0 }
 0x108   :  { %580 = vst [vmem:[%s1043_s6 + $0x98] sm:$0xff] %v448_v63  ;;  %v451_v1 = vpop.f32.mrb[22].mxu1  ;;  %v558_v2 = vadd.f32 %v676_v0, %v339_v39  ;;  %v552_v3 = vpop.f32.mrb[23].mxu0 }
 0x109   :  { %v452_v5 = vadd.f32 %v451_v1, %v899_v4  ;;  %v453_v7 = vpop.f32.mrb[23].mxu1  ;;  %v553_v8 = vadd.f32 %v552_v3, %v339_v39 }
 0x10a   :  { %584 = vst [vmem:[%s1043_s6 + $0xb8] sm:$0xff] %v558_v2  ;;  %v454_v9 = vadd.f32 %v453_v7, %v904_v6 }
 0x10b   :  { %582 = vst [vmem:[%s1043_s6 + $0xa8] sm:$0xff] %v452_v5  ;;  %581 = vst [vmem:[%s1043_s6 + $0xa0] sm:$0xff] %v553_v8 }
 0x10c   :  { %583 = vst [vmem:[%s1043_s6 + $0xb0] sm:$0xff] %v454_v9 }

// kernel: encoder_forward.3
= control target key start
LH: loop header
LB: loop body
LE: loop exit
PB: predicated region body
PF: predicated region fallthrough
CT: control target
= control target key end

     0   :  { %s1376_s27 = smov 0   ;;  %s1378_s28 = smov 0   ;;  %s1770_s0 = inlined_call_operand.vmem [shape: f32[64,384], index: 0, kind: input, shape index: {}]   ;;  %s1771_s1 = inlined_call_operand.vmem [shape: f32[64,384], index: 1, kind: input, shape index: {}]   ;;  %s1772_s2 = inlined_call_operand.vmem [shape: f32[128,384], index: 2, kind: input, shape index: {}]   ;;  %s1773_s3 = inlined_call_operand.vmem [shape: f32[128,384], index: 3, kind: input, shape index: {}]   ;;  %s1774_s4 = inlined_call_operand.vmem [shape: f32[1,128], index: 4, kind: input, shape index: {}]   ;;  %s1775_s5 = inlined_call_operand.vmem [shape: f32[1,128], index: 5, kind: input, shape index: {}]   ;;  %s1776_s6 = inlined_call_operand.vmem [shape: f32[8,8,128], index: 6, kind: output, shape index: {0}]   ;;  %s1777_s7 = inlined_call_operand.vmem [shape: f32[8,8,128], index: 7, kind: output, shape index: {1}]   ;;  %s1778_s8 = inlined_call_operand.vmem [shape: f32[2,8,128], index: 8, kind: output, shape index: {2}]  }
   0x1   :  { %s1380_s29 = smov 0  }
   0x2 LB: > { %s28_s30 = sadd.s32 1, %s1321_s28  ;;  %p1020_p0 = scmp.ge.s32.totalorder %s1325_s29, 1  ;;  %s1325_s29 = sphi %s1380_s29, %s19_s29   ;;  %s1321_s28 = sphi %s1378_s28, %s1780_s28   ;;  %s1317_s27 = sphi %s1376_s27, %s1779_s27  }
   0x3   : > { %p29_p1 = scmp.ge.s32.totalorder %s28_s30, 8  ;;  %p307_p2 = scmp.lt.s32.totalorder %s1325_s29, 9 }
   0x5   : > { %s1782_s30 = smov (%p29_p1, %s28_s30), 0  ;;  %p308_p3 = pnand %p1020_p0, %p307_p2 }
   0x6   : > { %p364_p4 = scmp.lt.s32.totalorder (!%p308_p3), %s1317_s27, 7  ;;  %s370_s9 = ssub.s32 (!%p308_p3), 7, %s1317_s27 }
   0x7   : > { %311 = sbr.rel (%p308_p3) target bundleno = 350 (0x15e), region = 44  ;;  %p372_p5 = scmp.lt.s32.totalorder (!%p308_p3), %s370_s9, 7 }
   0x8   : > { %p1025_p6 = scmp.ne.s32.totalorder (!%p308_p3), %s1317_s27, 0 }
   0xe   : > { %s365_s10 = scalar_select %p364_p4, %s1317_s27, 7 }
   0xf   : > { %s1784_s9 = smov (!%p372_p5, %s370_s9), 7  ;;  %402 = sbr.rel (%p1025_p6) target bundleno = 22 (0x16), region = 48 }
  0x10   : > { %s1253_s11 = smul.u32 24, %s365_s10  ;;  %s1023_s12 = sshll.u32 %s365_s10, 3  ;;  %v1327_v0 = vmov (!%p1025_p6), 0.0  }
  0x11   : > { %s1254_s13 = smul.u32 24, %s1784_s9  ;;  %s1402_s16 = scalar_lea.vmem %s1776_s6, %s1023_s12  ;;  %403 = vst [vmem:[#allocation2] sm:$0xff] (!%p1025_p6), %v1327_v0  ;;  %404 = vst [vmem:[#allocation3] sm:$0xff] (!%p1025_p6), %v1327_v0 }
  0x12   : > { %s1407_s19 = scalar_lea.vmem %s1770_s0, %s1253_s11  ;;  %s1024_s20 = sshll.u32 %s1784_s9, 3 }
  0x13   : > { %s1412_s23 = scalar_lea.vmem %s1771_s1, %s1254_s13  ;;  %s1417_s26 = scalar_lea.vmem %s1777_s7, %s1024_s20 }
  0x16 PF: > { %v406_v1 = vld [vmem:[%s1772_s2 + $0x8] sm:$0xff]  ;;  %v409_v2 = vld [vmem:[%s1772_s2 + $0x20] sm:$0xff]  ;;  %v408_v5 = vld [vmem:[%s1772_s2 + $0x18] sm:$0xff]  ;;  %v1328_v8 = vmov 0.0|0.0   ;;  %v1329_v9 = vmov 0.0   ;;  %vm1330_vm0 = vmmov 0  }
  0x17   : > { %v405_v3 = vld [vmem:[%s1772_s2] sm:$0xff]  ;;  %v1141_v4 = vpack.c.bf16 %v409_v2, %v406_v1  ;;  %v412_v6 = vld [vmem:[%s1772_s2 + $0x38] sm:$0xff]  ;;  %v415_v7 = vld [vmem:[%s1772_s2 + $0x50] sm:$0xff]  ;;  %1173 = vmatprep.subr.bf16.mxu1 %v1328_v8  ;;  %567 = vmatprep.mubr.f32.mxu0 %v1329_v9  ;;  %p1032_p7 = scmp.ne.s32.totalorder %s1317_s27, 7 }
  0x18   : > { %v1143_v10 = vpack.c.bf16 %v408_v5, %v405_v3  ;;  %v1145_v11 = vpack.c.bf16 %v415_v7, %v412_v6  ;;  %v411_v12 = vld [vmem:[%s1772_s2 + $0x30] sm:$0xff]  ;;  %v414_v13 = vld [vmem:[%s1772_s2 + $0x48] sm:$0xff]  ;;  %1103 = vmatprep.mubr.msk.f32.mxu1 %vm1330_vm0, %v1329_v9  ;;  %v421_v15 = vld [vmem:[%s1772_s2 + $0x80] sm:$0xff] }
  0x19   : > { %v418_v14 = vld [vmem:[%s1772_s2 + $0x68] sm:$0xff]  ;;  %1142 = vmatprep.subr.bf16.mxu0 %v1141_v4  ;;  %v1147_v16 = vpack.c.bf16 %v414_v13, %v411_v12  ;;  %v417_v18 = vld [vmem:[%s1772_s2 + $0x60] sm:$0xff]  ;;  %v420_v19 = vld [vmem:[%s1772_s2 + $0x78] sm:$0xff] }
  0x1a   : > { %1144 = vmatpush1.bf16.msra.mxu0 %v1143_v10  ;;  %v1149_v17 = vpack.c.bf16 %v421_v15, %v418_v14  ;;  %v424_v20 = vld [vmem:[%s1772_s2 + $0x98] sm:$0xff]  ;;  %v427_v21 = vld [vmem:[%s1772_s2 + $0xb0] sm:$0xff]  ;;  %v1151_v22 = vpack.c.bf16 %v420_v19, %v417_v18  ;;  %v426_v25 = vld [vmem:[%s1772_s2 + $0xa8] sm:$0xff] }
  0x1b   : > { %1146 = vmatprep.subr.bf16.mxu0 %v1145_v11  ;;  %v423_v23 = vld [vmem:[%s1772_s2 + $0x90] sm:$0xff]  ;;  %v1153_v24 = vpack.c.bf16 %v427_v21, %v424_v20  ;;  %v410_v27 = vld [vmem:[%s1772_s2 + $0x28] sm:$0xff]  ;;  %v433_v29 = vld [vmem:[%s1772_s2 + $0xe0] sm:$0xff] }
  0x1c   : > { %v407_v26 = vld [vmem:[%s1772_s2 + $0x10] sm:$0xff]  ;;  %v430_v28 = vld [vmem:[%s1772_s2 + $0xc8] sm:$0xff]  ;;  %v413_v31 = vld [vmem:[%s1772_s2 + $0x40] sm:$0xff]  ;;  %v1155_v33 = vpack.c.bf16 %v426_v25, %v423_v23 }
  0x1d   : > { %v1174_v30 = vpack.c.bf16 %v410_v27, %v407_v26  ;;  %v416_v32 = vld [vmem:[%s1772_s2 + $0x58] sm:$0xff]  ;;  %v1157_v35 = vpack.c.bf16 %v433_v29, %v430_v28  ;;  %v429_v36 = vld [vmem:[%s1772_s2 + $0xc0] sm:$0xff]  ;;  %v419_v38 = vld [vmem:[%s1772_s2 + $0x70] sm:$0xff] }
  0x1e   : > { %1148 = vmatpush1.bf16.msra.mxu0 %v1147_v16  ;;  %v1177_v34 = vpack.c.bf16 %v416_v32, %v413_v31  ;;  %v432_v37 = vld [vmem:[%s1772_s2 + $0xd8] sm:$0xff]  ;;  %v439_v40 = vld [vmem:[%s1772_s2 + $0x110] sm:$0xff]  ;;  %v422_v41 = vld [vmem:[%s1772_s2 + $0x88] sm:$0xff] }
  0x1f   : > { %1150 = vmatprep.subr.bf16.mxu0 %v1149_v17  ;;  %1175 = vmatpush3.bf16.msra.mxu1 %v1174_v30  ;;  %v436_v39 = vld [vmem:[%s1772_s2 + $0xf8] sm:$0xff]  ;;  %v1159_v42 = vpack.c.bf16 %v432_v37, %v429_v36  ;;  %v435_v43 = vld [vmem:[%s1772_s2 + $0xf0] sm:$0xff]  ;;  %v1180_v44 = vpack.c.bf16 %v422_v41, %v419_v38  ;;  %v438_v46 = vld [vmem:[%s1772_s2 + $0x108] sm:$0xff] }
  0x20   : > { %1176 = vmatprep.subr.bf16.mxu1 %v1328_v8  ;;  %v1161_v45 = vpack.c.bf16 %v439_v40, %v436_v39  ;;  %v425_v47 = vld [vmem:[%s1772_s2 + $0xa0] sm:$0xff]  ;;  %v428_v48 = vld [vmem:[%s1772_s2 + $0xb8] sm:$0xff]  ;;  %v442_v49 = vld [vmem:[%s1772_s2 + $0x128] sm:$0xff]  ;;  %v1163_v51 = vpack.c.bf16 %v438_v46, %v435_v43 }
  0x21   : > { %v445_v50 = vld [vmem:[%s1772_s2 + $0x140] sm:$0xff]  ;;  %v1183_v53 = vpack.c.bf16 %v428_v48, %v425_v47  ;;  %v444_v55 = vld [vmem:[%s1772_s2 + $0x138] sm:$0xff]  ;;  %v431_v56 = vld [vmem:[%s1772_s2 + $0xd0] sm:$0xff] }
  0x22   : > { %1152 = vmatpush1.bf16.msra.mxu0 %v1151_v22  ;;  %v441_v52 = vld [vmem:[%s1772_s2 + $0x120] sm:$0xff]  ;;  %v1165_v54 = vpack.c.bf16 %v445_v50, %v442_v49  ;;  %v434_v57 = vld [vmem:[%s1772_s2 + $0xe8] sm:$0xff]  ;;  %v448_v58 = vld [vmem:[%s1772_s2 + $0x158] sm:$0xff] }
  0x23   : > { %1154 = vmatprep.subr.bf16.mxu0 %v1153_v24  ;;  %1178 = vmatpush3.bf16.msra.mxu1 %v1177_v34  ;;  %v451_v59 = vld [vmem:[%s1772_s2 + $0x170] sm:$0xff]  ;;  %v1167_v60 = vpack.c.bf16 %v444_v55, %v441_v52  ;;  %v1186_v62 = vpack.c.bf16 %v434_v57, %v431_v56  ;;  %v450_v0 = vld [vmem:[%s1772_s2 + $0x168] sm:$0xff]  ;;  %v437_v1 = vld [vmem:[%s1772_s2 + $0x100] sm:$0xff] }
  0x24   : > { %1179 = vmatprep.subr.bf16.mxu1 %v1328_v8  ;;  %v447_v61 = vld [vmem:[%s1772_s2 + $0x150] sm:$0xff]  ;;  %v1169_v63 = vpack.c.bf16 %v451_v59, %v448_v58  ;;  %v440_v2 = vld [vmem:[%s1772_s2 + $0x118] sm:$0xff]  ;;  %v454_v3 = vld [vmem:[%s1773_s3 + $0x8] sm:$0xff] }
  0x25   : > { %v457_v4 = vld [vmem:[%s1773_s3 + $0x20] sm:$0xff]  ;;  %v1171_v5 = vpack.c.bf16 %v450_v0, %v447_v61  ;;  %v1189_v7 = vpack.c.bf16 %v440_v2, %v437_v1  ;;  %v456_v11 = vld [vmem:[%s1773_s3 + $0x18] sm:$0xff]  ;;  %v443_v12 = vld [vmem:[%s1772_s2 + $0x130] sm:$0xff] }
  0x26   : > { %1156 = vmatpush1.bf16.msra.mxu0 %v1155_v33  ;;  %v453_v6 = vld [vmem:[%s1773_s3] sm:$0xff]  ;;  %v1197_v10 = vpack.c.bf16 %v457_v4, %v454_v3  ;;  %v446_v13 = vld [vmem:[%s1772_s2 + $0x148] sm:$0xff]  ;;  %v460_v14 = vld [vmem:[%s1773_s3 + $0x38] sm:$0xff] }
  0x27   : > { %1158 = vmatprep.subr.bf16.mxu0 %v1157_v35  ;;  %1181 = vmatpush3.bf16.msra.mxu1 %v1180_v44  ;;  %v463_v15 = vld [vmem:[%s1773_s3 + $0x50] sm:$0xff]  ;;  %v1585_v16 = vld [vmem:[#allocation2] sm:$0xff]  ;;  %v1199_v17 = vpack.c.bf16 %v456_v11, %v453_v6  ;;  %v1192_v19 = vpack.c.bf16 %v446_v13, %v443_v12  ;;  %v462_v21 = vld [vmem:[%s1773_s3 + $0x48] sm:$0xff] }
  0x28   : > { %1182 = vmatprep.subr.bf16.mxu1 %v1328_v8  ;;  %v459_v18 = vld [vmem:[%s1773_s3 + $0x30] sm:$0xff]  ;;  %v1201_v20 = vpack.c.bf16 %v463_v15, %v460_v14  ;;  %v449_v22 = vld [vmem:[%s1772_s2 + $0x160] sm:$0xff]  ;;  %v452_v23 = vld [vmem:[%s1772_s2 + $0x178] sm:$0xff] }
  0x29   : > { %v466_v24 = vld [vmem:[%s1773_s3 + $0x68] sm:$0xff]  ;;  %v469_v25 = vld [vmem:[%s1773_s3 + $0x80] sm:$0xff]  ;;  %v1203_v26 = vpack.c.bf16 %v462_v21, %v459_v18  ;;  %v1195_v28 = vpack.c.bf16 %v452_v23, %v449_v22  ;;  %v468_v30 = vld [vmem:[%s1773_s3 + $0x78] sm:$0xff] }
  0x2a   : > { %1160 = vmatpush1.bf16.msra.mxu0 %v1159_v42  ;;  %v465_v27 = vld [vmem:[%s1773_s3 + $0x60] sm:$0xff]  ;;  %v1205_v29 = vpack.c.bf16 %v469_v25, %v466_v24  ;;  %v455_v31 = vld [vmem:[%s1773_s3 + $0x10] sm:$0xff]  ;;  %v458_v32 = vld [vmem:[%s1773_s3 + $0x28] sm:$0xff] }
  0x2b   : > { %1162 = vmatprep.subr.bf16.mxu0 %v1161_v45  ;;  %1184 = vmatpush3.bf16.msra.mxu1 %v1183_v53  ;;  %v472_v33 = vld [vmem:[%s1773_s3 + $0x98] sm:$0xff]  ;;  %v475_v34 = vld [vmem:[%s1773_s3 + $0xb0] sm:$0xff]  ;;  %v1207_v35 = vpack.c.bf16 %v468_v30, %v465_v27  ;;  %v1230_v37 = vpack.c.bf16 %v458_v32, %v455_v31  ;;  %v474_v39 = vld [vmem:[%s1773_s3 + $0xa8] sm:$0xff] }
  0x2c   : > { %1185 = vmatprep.subr.bf16.mxu1 %v1328_v8  ;;  %v471_v36 = vld [vmem:[%s1773_s3 + $0x90] sm:$0xff]  ;;  %v1209_v38 = vpack.c.bf16 %v475_v34, %v472_v33  ;;  %v461_v40 = vld [vmem:[%s1773_s3 + $0x40] sm:$0xff]  ;;  %v464_v41 = vld [vmem:[%s1773_s3 + $0x58] sm:$0xff] }
  0x2d   : > { %v478_v42 = vld [vmem:[%s1773_s3 + $0xc8] sm:$0xff]  ;;  %v481_v43 = vld [vmem:[%s1773_s3 + $0xe0] sm:$0xff]  ;;  %v1211_v44 = vpack.c.bf16 %v474_v39, %v471_v36  ;;  %v1233_v46 = vpack.c.bf16 %v464_v41, %v461_v40  ;;  %v480_v48 = vld [vmem:[%s1773_s3 + $0xd8] sm:$0xff] }
  0x2e   : > { %1164 = vmatpush1.bf16.msra.mxu0 %v1163_v51  ;;  %v477_v45 = vld [vmem:[%s1773_s3 + $0xc0] sm:$0xff]  ;;  %v1213_v47 = vpack.c.bf16 %v481_v43, %v478_v42  ;;  %v467_v49 = vld [vmem:[%s1773_s3 + $0x70] sm:$0xff]  ;;  %v470_v50 = vld [vmem:[%s1773_s3 + $0x88] sm:$0xff] }
  0x2f   : > { %1166 = vmatprep.subr.bf16.mxu0 %v1165_v54  ;;  %1187 = vmatpush3.bf16.msra.mxu1 %v1186_v62  ;;  %v484_v51 = vld [vmem:[%s1773_s3 + $0xf8] sm:$0xff]  ;;  %v487_v52 = vld [vmem:[%s1773_s3 + $0x110] sm:$0xff]  ;;  %v1215_v53 = vpack.c.bf16 %v480_v48, %v477_v45  ;;  %v1236_v55 = vpack.c.bf16 %v470_v50, %v467_v49  ;;  %v486_v57 = vld [vmem:[%s1773_s3 + $0x108] sm:$0xff] }
  0x30   : > { %1188 = vmatprep.subr.bf16.mxu1 %v1328_v8  ;;  %v483_v54 = vld [vmem:[%s1773_s3 + $0xf0] sm:$0xff]  ;;  %v1217_v56 = vpack.c.bf16 %v487_v52, %v484_v51  ;;  %v476_v58 = vld [vmem:[%s1773_s3 + $0xb8] sm:$0xff]  ;;  %v490_v59 = vld [vmem:[%s1773_s3 + $0x128] sm:$0xff] }
  0x31   : > { %v1219_v61 = vpack.c.bf16 %v486_v57, %v483_v54  ;;  %v489_v62 = vld [vmem:[%s1773_s3 + $0x120] sm:$0xff]  ;;  %v492_v1 = vld [vmem:[%s1773_s3 + $0x138] sm:$0xff]  ;;  %v479_v2 = vld [vmem:[%s1773_s3 + $0xd0] sm:$0xff] }
  0x32   : > { %1168 = vmatpush1.bf16.msra.mxu0 %v1167_v60  ;;  %v493_v60 = vld [vmem:[%s1773_s3 + $0x140] sm:$0xff]  ;;  %v482_v3 = vld [vmem:[%s1773_s3 + $0xe8] sm:$0xff]  ;;  %v496_v4 = vld [vmem:[%s1773_s3 + $0x158] sm:$0xff]  ;;  %v1223_v6 = vpack.c.bf16 %v492_v1, %v489_v62 }
  0x33   : > { %1170 = vmatprep.subr.bf16.mxu0 %v1169_v63  ;;  %1190 = vmatpush3.bf16.msra.mxu1 %v1189_v7  ;;  %v1221_v0 = vpack.c.bf16 %v493_v60, %v490_v59  ;;  %v495_v7 = vld [vmem:[%s1773_s3 + $0x150] sm:$0xff]  ;;  %v498_v12 = vld [vmem:[%s1773_s3 + $0x168] sm:$0xff]  ;;  %v485_v13 = vld [vmem:[%s1773_s3 + $0x100] sm:$0xff] }
  0x34   : > { %1191 = vmatprep.subr.bf16.mxu1 %v1328_v8  ;;  %v488_v14 = vld [vmem:[%s1773_s3 + $0x118] sm:$0xff]  ;;  %v1227_v15 = vpack.c.bf16 %v498_v12, %v495_v7  ;;  %v491_v18 = vld [vmem:[%s1773_s3 + $0x130] sm:$0xff]  ;;  %v497_v22 = vld [vmem:[%s1773_s3 + $0x160] sm:$0xff] }
  0x35   : > { %v500_v23 = vld [vmem:[%s1773_s3 + $0x178] sm:$0xff]  ;;  %v785_v25 = vld [vmem:[%s1407_s19] sm:$0xff]  ;;  %v787_v41 = vld [vmem:[%s1407_s19 + $0x10] sm:$0xff] }
  0x36   : > { %1172 = vmatpush1.bf16.msra.mxu0 %v1171_v5  ;;  %v499_v5 = vld [vmem:[%s1773_s3 + $0x170] sm:$0xff]  ;;  %v1251_v24 = vpack.c.bf16 %v500_v23, %v497_v22  ;;  %v817_v43 = vld [vmem:[%s1412_s23] sm:$0xff]  ;;  %v818_v48 = vld [vmem:[%s1412_s23 + $0x8] sm:$0xff] }
  0x37   : > { %1198 = vmatprep.subr.bf16.mxu0 %v1197_v10  ;;  %1193 = vmatpush3.bf16.msra.mxu1 %v1192_v19  ;;  %v1242_v10 = vpack.c.bf16 %v482_v3, %v479_v2  ;;  %v1225_v11 = vpack.c.bf16 %v499_v5, %v496_v4  ;;  %v494_v19 = vld [vmem:[%s1773_s3 + $0x148] sm:$0xff]  ;;  %v1031_v62 = vld [vmem:[%s1775_s5] ss:$0 sm:$0xff]  ;;  %v819_v2 = vld [vmem:[%s1412_s23 + $0x10] sm:$0xff] }
  0x38   : > { %1194 = vmatprep.subr.bf16.mxu1 %v1328_v8  ;;  %v1248_v21 = vpack.c.bf16 %v494_v19, %v491_v18 }
  0x39   : > { %568 = vmatmul.mubr.f32.vlgmr.msra.gmra.mrb[0].mxu0 %v1585_v16 }
  0x3a   : > { %1200 = vmatpush1.bf16.msra.mxu0 %v1199_v17  ;;  %708 = vmatprep.mubr.f32.mxu0 %v1329_v9  ;;  %v1245_v17 = vpack.c.bf16 %v488_v14, %v485_v13 }
  0x3b   : > { %1202 = vmatprep.subr.bf16.mxu0 %v1201_v20  ;;  %1196 = vmatpush3.bf16.msra.mxu1 %v1195_v28  ;;  %v1726_v20 = vld [vmem:[#allocation3] sm:$0xff] }
  0x3c   : > { %1229 = vmatprep.subr.bf16.mxu1 %v1328_v8 }
  0x3e   : > { %1204 = vmatpush1.bf16.msra.mxu0 %v1203_v26  ;;  %1104 = vmatmul.mubr.f32.vlgmr.msra.gmra.mrb[0].mxu1 %v1585_v16 }
  0x3f   : > { %1206 = vmatprep.subr.bf16.mxu0 %v1205_v29  ;;  %1231 = vmatpush3.bf16.msra.mxu1 %v1230_v37  ;;  %v786_v29 = vld [vmem:[%s1407_s19 + $0x8] sm:$0xff]  ;;  %v1028_v37 = vld [vmem:[%s1774_s4] ss:$0 sm:$0xff] }
  0x40   : > { %1232 = vmatprep.subr.bf16.mxu1 %v1328_v8  ;;  %1138 = vmatprep.mubr.msk.f32.mxu1 %vm1330_vm0, %v1329_v9  ;;  %v473_v9 = vld [vmem:[%s1773_s3 + $0xa0] sm:$0xff] }
  0x41   : > { %v1239_v63 = vpack.c.bf16 %v476_v58, %v473_v9 }
  0x42   : > { %1208 = vmatpush1.bf16.msra.mxu0 %v1207_v35 }
  0x43   : > { %1210 = vmatprep.subr.bf16.mxu0 %v1209_v38  ;;  %1234 = vmatpush3.bf16.msra.mxu1 %v1233_v46 }
  0x44   : > { %1235 = vmatprep.subr.bf16.mxu1 %v1328_v8 }
  0x46   : > { %1212 = vmatpush1.bf16.msra.mxu0 %v1211_v44 }
  0x47   : > { %1214 = vmatprep.subr.bf16.mxu0 %v1213_v47  ;;  %1237 = vmatpush3.bf16.msra.mxu1 %v1236_v55 }
  0x48   : > { %1238 = vmatprep.subr.bf16.mxu1 %v1328_v8 }
  0x4a   : > { %1216 = vmatpush1.bf16.msra.mxu0 %v1215_v53 }
  0x4b   : > { %1218 = vmatprep.subr.bf16.mxu0 %v1217_v56  ;;  %1240 = vmatpush3.bf16.msra.mxu1 %v1239_v63 }
  0x4c   : > { %1241 = vmatprep.subr.bf16.mxu1 %v1328_v8 }
  0x4e   : > { %1220 = vmatpush1.bf16.msra.mxu0 %v1219_v61 }
  0x4f   : > { %1222 = vmatprep.subr.bf16.mxu0 %v1221_v0  ;;  %1243 = vmatpush3.bf16.msra.mxu1 %v1242_v10 }
  0x50   : > { %1244 = vmatprep.subr.bf16.mxu1 %v1328_v8 }
  0x52   : > { %1224 = vmatpush1.bf16.msra.mxu0 %v1223_v6 }
  0x53   : > { %1226 = vmatprep.subr.bf16.mxu0 %v1225_v11  ;;  %1246 = vmatpush3.bf16.msra.mxu1 %v1245_v17 }
  0x54   : > { %1247 = vmatprep.subr.bf16.mxu1 %v1328_v8 }
  0x56   : > { %1228 = vmatpush1.bf16.msra.mxu0 %v1227_v15 }
  0x57   : > { %1249 = vmatpush3.bf16.msra.mxu1 %v1248_v21 }
  0x58   : > { %1250 = vmatprep.subr.bf16.mxu1 %v1328_v8 }
  0x59   : > { %709 = vmatmul.mubr.f32.vlgmr.msra.gmra.mrb[2].mxu0 %v1726_v20 }
  0x5b   : > { %1252 = vmatpush3.bf16.msra.mxu1 %v1251_v24 }
  0x5e   : > { %1139 = vmatmul.mubr.f32.vlgmr.msra.gmra.mrb[2].mxu1 %v1726_v20 }
 0x10c   : > { %v569_v26 = vpop.f32.mrb[0].mxu0 }
 0x10d   : > { %v789_v27 = vadd.f32 %v785_v25, %v569_v26  ;;  %v571_v28 = vpop.f32.mrb[1].mxu0 }
 0x10e   : > { %v796_v31 = vadd.f32 %v786_v29, %v571_v28 }
 0x10f   : > { %v1026_v30 = vmul.f32 -1.442695, %v789_v27 }
 0x110   : > { %v1027_v32 = vmul.f32 -1.442695, %v796_v31 }
 0x111   : > { %1283 = vpow2.f32 %v1026_v30  ;;  %v640_v33 = vpop.f32.mrb[0].mxu1 }
 0x112   : > { %v1105_v34 = vpop.f32.mrb[1].mxu1  ;;  %1285 = vpow2.f32 %v1027_v32  ;;  %v809_v39 = vadd.f32 %v1028_v37, %v640_v33 }
 0x11b   : > { %v1284_v35 = vpop.eup %1283 }
 0x11c   : > { %v793_v36 = vadd.f32 1.0, %v1284_v35  ;;  %v1286_v8 = vpop.eup %1285 }
 0x11d   : > { %v800_v38 = vadd.f32 1.0, %v1286_v8 }
 0x11e   : > { %1287 = vrcp.f32 %v793_v36 }
 0x11f   : > { %1289 = vrcp.f32 %v800_v38 }
 0x128   : > { %v1288_v40 = vpop.eup %1287 }
 0x129   : > { %v810_v42 = vmul.f32 %v1288_v40, %v809_v39  ;;  %v1290_v51 = vpop.eup %1289 }
 0x12a   : > { %v813_v55 = vsub.f32 1.0, %v1290_v51  ;;  %v815_v57 = vmul.f32 %v1290_v51, %v1585_v16 }
 0x12b   : > { %v811_v44 = vadd.f32 %v810_v42, %v787_v41 }
 0x12c   : > { %v710_v45 = vpop.f32.mrb[2].mxu0 }
 0x12d   : > { %1291 = vtanh.f32 %v811_v44  ;;  %v821_v46 = vadd.f32 %v817_v43, %v710_v45  ;;  %v712_v47 = vpop.f32.mrb[3].mxu0 }
 0x12e   : > { %v828_v50 = vadd.f32 %v818_v48, %v712_v47 }
 0x12f   : > { %v1029_v49 = vmul.f32 -1.442695, %v821_v46 }
 0x130   : > { %v1030_v52 = vmul.f32 -1.442695, %v828_v50 }
 0x131   : > { %1293 = vpow2.f32 %v1029_v49  ;;  %v781_v53 = vpop.f32.mrb[2].mxu1 }
 0x132   : > { %v1140_v54 = vpop.f32.mrb[3].mxu1  ;;  %1295 = vpow2.f32 %v1030_v52  ;;  %v841_v0 = vadd.f32 %v1031_v62, %v781_v53 }
 0x137   : > { %v1292_v56 = vpop.eup %1291 }
 0x138   : > { %v814_v9 = vmul.f32 %v1292_v56, %v813_v55 }
 0x13a   : > { %v816_v58 = vadd.f32 %v815_v57, %v814_v9 }
 0x13b   : > { %v1294_v59 = vpop.eup %1293 }
 0x13c   : > { %849 = vst [vmem:[#allocation2] sm:$0xff] %v816_v58  ;;  %851 = vst [vmem:[%s1402_s16] sm:$0xff] %v816_v58  ;;  %v825_v60 = vadd.f32 1.0, %v1294_v59  ;;  %v1296_v61 = vpop.eup %1295 }
 0x13d   : > { %v832_v63 = vadd.f32 1.0, %v1296_v61  ;;  %857 = vst [vmem:[%s1778_s8] sm:$0xff] (!%p1032_p7), %v816_v58 }
 0x13e   : > { %1297 = vrcp.f32 %v825_v60 }
 0x13f   : > { %1299 = vrcp.f32 %v832_v63 }
 0x148   : > { %v1298_v1 = vpop.eup %1297 }
 0x149   : > { %v842_v16 = vmul.f32 %v1298_v1, %v841_v0  ;;  %v1300_v4 = vpop.eup %1299 }
 0x14a   : > { %v845_v5 = vsub.f32 1.0, %v1300_v4  ;;  %v847_v7 = vmul.f32 %v1300_v4, %v1726_v20 }
 0x14b   : > { %v843_v3 = vadd.f32 %v842_v16, %v819_v2 }
 0x14d   : > { %1301 = vtanh.f32 %v843_v3 }
 0x156   : > { %856 = sbr.rel (%p1032_p7) target bundleno = 350 (0x15e), region = 52 }
 0x157   : > { %v1302_v6 = vpop.eup %1301 }
 0x158   : > { %v846_v10 = vmul.f32 %v1302_v6, %v845_v5 }
 0x15a   : > { %v848_v11 = vadd.f32 %v847_v7, %v846_v10 }
 0x15c   : > { %850 = vst [vmem:[#allocation3] sm:$0xff] %v848_v11  ;;  %852 = vst [vmem:[%s1417_s26] sm:$0xff] %v848_v11 }
 0x15d   : > { %1033 = vst [vmem:[%s1778_s8 + $0x8] sm:$0xff] %v848_v11 }
 0x15e PF: > { %s19_s29 = sadd.s32 1, %s1325_s29   ;;  %s1779_s27 = smov %s1321_s28 }
 0x15f   : > { %p16_p8 = scmp.ge.s32.totalorder %s19_s29, 10   ;;  %s1780_s28 = smov %s1782_s30 }
 0x161   :  { %18 = sbr.rel (!%p16_p8) target bundleno = 2 (0x2), region = 110 }

</bundles_post_ra>
